<compile_context>
chip_gen: v7x
topology: tpu7x:2x2x1
jax: 0.10.0
libtpu: 0.0.40
codegen_flags: <defaults>
</compile_context>

<pallas_src>
import jax
import jax.numpy as jnp
from jax.experimental import pallas as pl
from jax.experimental.pallas import tpu as pltpu


def _round_up(x: int, m: int) -> int:
    return ((x + m - 1) // m) * m


def _cdiv(a: int, b: int) -> int:
    return (a + b - 1) // b


def _mlp_policy_kernel(obs_ref, goal_ref, w1a_ref, w1b_ref, b1_ref,
                       w2_ref, b2_ref, w3_ref, b3_ref, out_ref):
    # One batch tile per grid step; weights stay VMEM-resident across steps.
    obs = obs_ref[...].astype(jnp.bfloat16)       # (tb, obs_dim)
    goal = goal_ref[...].astype(jnp.bfloat16)     # (tb, goal_dim)
    # concat([obs, goal]) @ W1  ==  obs @ W1[:obs_dim] + goal @ W1[obs_dim:]
    h1 = jnp.dot(obs, w1a_ref[...], preferred_element_type=jnp.float32)
    h1 = h1 + jnp.dot(goal, w1b_ref[...], preferred_element_type=jnp.float32)
    h1 = jnp.maximum(h1 + b1_ref[...], 0.0)       # f32 epilogue
    # TODO(synk): nn.Dropout(pdrop) is identity in eval mode; training-mode
    # stochastic dropout (pltpu.prng_*) is intentionally not applied here.
    h2 = jnp.dot(h1.astype(jnp.bfloat16), w2_ref[...],
                 preferred_element_type=jnp.float32)
    h2 = jnp.maximum(h2 + b2_ref[...], 0.0)
    a = jnp.dot(h2.astype(jnp.bfloat16), w3_ref[...],
                preferred_element_type=jnp.float32) + b3_ref[...]
    out_ref[...] = a.astype(out_ref.dtype)        # single cast at the store


def _pick_tb(batch: int) -> int:
    """Batch tile: 16-aligned (bf16 packs 16 rows/vreg), <=512 rows, >=2
    (ideally 4) grid steps when the batch allows, minimal tail padding."""
    if batch < 16:
        return _round_up(max(batch, 8), 8)
    steps = max(1, _cdiv(batch, 512))
    # Prefer >=4 steps (megacore sharding + DMA/compute overlap) while tiles
    # keep a full 256-row MXU pass (v6e/v7x) ...
    while steps < 4 and _cdiv(batch, steps + 1) >= 256:
        steps += 1
    # ... and at least 2 steps whenever the tiles stay >=16 rows.
    if steps < 2 and _cdiv(batch, 2) >= 16:
        steps = 2
    return min(512, _round_up(_cdiv(batch, steps), 16))


def _vmem_footprint(tb, obs_dim, goal_dim, emb_p, act_p, in_itemsize,
                    weight_bufs):
    """Bytes of VMEM actually live per grid step (incl. intermediates)."""
    weights = 2 * weight_bufs * ((obs_dim + goal_dim) * emb_p
                                 + emb_p * emb_p + emb_p * act_p)   # bf16
    biases = 4 * weight_bufs * (2 * emb_p + act_p)                  # f32
    x_tiles = 2 * in_itemsize * tb * (obs_dim + goal_dim)           # 2-buf in
    out_tiles = 2 * 2 * tb * act_p                                  # 2-buf bf16
    interm = 12 * tb * emb_p + 4 * tb * act_p   # h1/h2 f32+bf16, f32 acc
    return weights + biases + x_tiles + out_tiles + interm


def mlp_policy_forward(obs, goal, params, out_dtype=jnp.bfloat16):
    """Fused 3-layer MLP policy forward with a batch-tiled 'parallel' grid."""
    w1, b1, w2, b2, w3, b3 = params
    batch, obs_dim = obs.shape
    goal_dim = goal.shape[1]
    embed_dim = w1.shape[1]
    action_dim = w3.shape[1]

    # Lane-dense padding of the hidden / output feature dims.
    emb_p = _round_up(embed_dim, 128)
    act_p = _round_up(action_dim, 128)

    # Per-generation VMEM budget: ~48 MiB on v7x (64 MiB phys), ~96 MiB on
    # v5e/v6e (128 MiB phys), leaving headroom for Mosaic internal scratch.
    try:
        phys_vmem = int(pltpu.get_tpu_info().vmem_capacity_bytes)
    except Exception:
        phys_vmem = 64 * 1024 * 1024
    vmem_cap = min((phys_vmem * 3) // 4, 100 * 1024 * 1024)

    in_itemsize = jnp.dtype(obs.dtype).itemsize
    tb = _pick_tb(batch)
    while tb > 16 and _vmem_footprint(tb, obs_dim, goal_dim, emb_p, act_p,
                                      in_itemsize, 1) > vmem_cap:
        tb = max(16, _round_up(tb // 2, 16))

    grid = (_cdiv(batch, tb),)

    def pad2(a, r, c):
        return jnp.pad(a, ((0, r - a.shape[0]), (0, c - a.shape[1])))

    # Weight prep (pad + bf16 cast) is cheap and constant-folds under jit for
    # fixed params; in production pre-pad/pre-cast the params once.
    w1a = pad2(w1[:obs_dim], obs_dim, emb_p).astype(jnp.bfloat16)
    w1b = pad2(w1[obs_dim:], goal_dim, emb_p).astype(jnp.bfloat16)
    w2p = pad2(w2, emb_p, emb_p).astype(jnp.bfloat16)
    w3p = pad2(w3, emb_p, act_p).astype(jnp.bfloat16)
    b1p = pad2(b1, 1, emb_p).astype(jnp.float32)
    b2p = pad2(b2, 1, emb_p).astype(jnp.float32)
    b3p = pad2(b3, 1, act_p).astype(jnp.float32)

    tile = lambda i: (i, 0)
    const = lambda i: (0, 0)

    def build(single_buffered_weights):
        if single_buffered_weights:
            res = lambda shape: pl.BlockSpec(shape, const,
                                             pipeline_mode=pl.Buffered(1))
        else:
            res = lambda shape: pl.BlockSpec(shape, const)
        wb = 1 if single_buffered_weights else 2
        footprint = _vmem_footprint(tb, obs_dim, goal_dim, emb_p, act_p,
                                    in_itemsize, wb)
        vmem_limit = int(min(vmem_cap,
                             max(32 * 1024 * 1024, (5 * footprint) // 4)))
        return pl.pallas_call(
            _mlp_policy_kernel,
            out_shape=jax.ShapeDtypeStruct((batch, act_p), out_dtype),
            grid=grid,
            in_specs=[
                pl.BlockSpec((tb, obs_dim), tile),     # obs tiles (streamed)
                pl.BlockSpec((tb, goal_dim), tile),    # goal tiles (streamed)
                res((obs_dim, emb_p)),                 # W1[:obs_dim] (resident)
                res((goal_dim, emb_p)),                # W1[obs_dim:] (resident)
                res((1, emb_p)),                       # b1
                res((emb_p, emb_p)),                   # W2
                res((1, emb_p)),                       # b2
                res((emb_p, act_p)),                   # W3
                res((1, act_p)),                       # b3
            ],
            out_specs=pl.BlockSpec((tb, act_p), tile),
            compiler_params=pltpu.CompilerParams(
                dimension_semantics=("parallel",),
                vmem_limit_bytes=vmem_limit),
        )

    args = (obs, goal, w1a, w1b, b1p, w2p, b2p, w3p, b3p)
    try:
        out_padded = build(True)(*args)
    except Exception:
        # pl.Buffered(1) not accepted by this jax version/backend: fall back
        # to default (double-buffered) resident weights.
        out_padded = build(False)(*args)

    return out_padded[:, :action_dim]


def init_params(key, obs_dim, goal_dim, embed_dim, action_dim):
    """Deterministic synthetic parameters (shapes from MLPPolicy.__init__).

    Weights stored as (in_features, out_features) so y = x @ W + b; biases as
    (1, out) rows for TPU-friendly broadcasting."""
    ks = jax.random.split(key, 6)
    in_dim = obs_dim + goal_dim
    s1 = 1.0 / jnp.sqrt(in_dim)
    s2 = 1.0 / jnp.sqrt(embed_dim)
    w1 = jax.random.uniform(ks[0], (in_dim, embed_dim), jnp.float32, -s1, s1)
    b1 = jax.random.uniform(ks[1], (1, embed_dim), jnp.float32, -s1, s1)
    w2 = jax.random.uniform(ks[2], (embed_dim, embed_dim), jnp.float32, -s2, s2)
    b2 = jax.random.uniform(ks[3], (1, embed_dim), jnp.float32, -s2, s2)
    w3 = jax.random.uniform(ks[4], (embed_dim, action_dim), jnp.float32, -s2, s2)
    b3 = jax.random.uniform(ks[5], (1, action_dim), jnp.float32, -s2, s2)
    return (w1, b1, w2, b2, w3, b3)


def reference_forward(obs, goal, params):
    """Pure-JAX f32 reference of the PyTorch module (eval mode)."""
    w1, b1, w2, b2, w3, b3 = params
    x = jnp.concatenate([obs, goal], axis=-1)
    h = jnp.maximum(x @ w1 + b1, 0.0)
    h = jnp.maximum(h @ w2 + b2, 0.0)
    return h @ w3 + b3


if __name__ == "__main__":
    # Small shapes consistent with the module; batch=32 exercises a 2-step
    # grid with exact (no-tail) 16-row bf16 tiles.
    batch, obs_dim, goal_dim, embed_dim, action_dim = 32, 16, 16, 32, 8

    key = jax.random.PRNGKey(0)
    k_obs, k_goal, k_par = jax.random.split(key, 3)
    obs = jax.random.normal(k_obs, (batch, obs_dim), jnp.float32)
    goal = jax.random.normal(k_goal, (batch, goal_dim), jnp.float32)
    params = init_params(k_par, obs_dim, goal_dim, embed_dim, action_dim)

    out = mlp_policy_forward(obs, goal, params)
    out = jax.block_until_ready(out)

    ref = reference_forward(obs, goal, params)
    assert out.shape == (batch, action_dim)
    out_f32 = out.astype(jnp.float32)
    # bf16 MXU operands + bf16 output store (f32 accumulation) -> ~1e-2 error.
    assert jnp.allclose(out_f32, ref, atol=5e-2, rtol=5e-2), (
        float(jnp.max(jnp.abs(out_f32 - ref))))

    print("KERNEL_OK")
</pallas_src>

<mosaic_0001>
module attributes {stable_mosaic.version = 11 : i64} {
  func.func @_mlp_policy_kernel(%arg0: i32, %arg1: memref<16x16xf32, #tpu.memory_space<vmem>>, %arg2: memref<16x16xf32, #tpu.memory_space<vmem>>, %arg3: memref<16x128xbf16, #tpu.memory_space<vmem>>, %arg4: memref<16x128xbf16, #tpu.memory_space<vmem>>, %arg5: memref<1x128xf32, #tpu.memory_space<vmem>>, %arg6: memref<128x128xbf16, #tpu.memory_space<vmem>>, %arg7: memref<1x128xf32, #tpu.memory_space<vmem>>, %arg8: memref<128x128xbf16, #tpu.memory_space<vmem>>, %arg9: memref<1x128xf32, #tpu.memory_space<vmem>>, %arg10: memref<16x128xbf16, #tpu.memory_space<vmem>>) attributes {dimension_semantics = [#tpu.dimension_semantics<parallel>], iteration_bounds = array<i64: 2>, scalar_prefetch = 0 : i64, scratch_operands = 0 : i64, tpu.core_type = #tpu.core_type<tc>, window_params = [{transform_indices = @transform_0, window_bounds = array<i64: 16, 16>}, {transform_indices = @transform_1, window_bounds = array<i64: 16, 16>}, {pipeline_mode = #tpu.pipeline_mode<synchronous>, transform_indices = @transform_2, window_bounds = array<i64: 16, 128>}, {pipeline_mode = #tpu.pipeline_mode<synchronous>, transform_indices = @transform_3, window_bounds = array<i64: 16, 128>}, {pipeline_mode = #tpu.pipeline_mode<synchronous>, transform_indices = @transform_4, window_bounds = array<i64: 1, 128>}, {pipeline_mode = #tpu.pipeline_mode<synchronous>, transform_indices = @transform_5, window_bounds = array<i64: 128, 128>}, {pipeline_mode = #tpu.pipeline_mode<synchronous>, transform_indices = @transform_6, window_bounds = array<i64: 1, 128>}, {pipeline_mode = #tpu.pipeline_mode<synchronous>, transform_indices = @transform_7, window_bounds = array<i64: 128, 128>}, {pipeline_mode = #tpu.pipeline_mode<synchronous>, transform_indices = @transform_8, window_bounds = array<i64: 1, 128>}, {transform_indices = @transform_9, window_bounds = array<i64: 16, 128>}]} {
    %c0 = arith.constant 0 : index
    %c0_0 = arith.constant 0 : index
    %0 = vector.load %arg1[%c0, %c0_0] : memref<16x16xf32, #tpu.memory_space<vmem>>, vector<16x16xf32>
    %1 = arith.truncf %0 : vector<16x16xf32> to vector<16x16xbf16>
    %c0_1 = arith.constant 0 : index
    %c0_2 = arith.constant 0 : index
    %2 = vector.load %arg2[%c0_1, %c0_2] : memref<16x16xf32, #tpu.memory_space<vmem>>, vector<16x16xf32>
    %3 = arith.truncf %2 : vector<16x16xf32> to vector<16x16xbf16>
    %c0_3 = arith.constant 0 : index
    %c0_4 = arith.constant 0 : index
    %4 = vector.load %arg3[%c0_3, %c0_4] : memref<16x128xbf16, #tpu.memory_space<vmem>>, vector<16x128xbf16>
    %cst = arith.constant dense<0.000000e+00> : vector<16x128xf32>
    %5 = tpu.matmul %1, %4, %cst {dimension_numbers = #tpu.dot_dimension_numbers<[1], [0], [0], [1], [0, 0, 1, 1], [], []>} : vector<16x16xbf16>, vector<16x128xbf16>, vector<16x128xf32> -> vector<16x128xf32>
    %c0_5 = arith.constant 0 : index
    %c0_6 = arith.constant 0 : index
    %6 = vector.load %arg4[%c0_5, %c0_6] : memref<16x128xbf16, #tpu.memory_space<vmem>>, vector<16x128xbf16>
    %cst_7 = arith.constant dense<0.000000e+00> : vector<16x128xf32>
    %7 = tpu.matmul %3, %6, %cst_7 {dimension_numbers = #tpu.dot_dimension_numbers<[1], [0], [0], [1], [0, 0, 1, 1], [], []>} : vector<16x16xbf16>, vector<16x128xbf16>, vector<16x128xf32> -> vector<16x128xf32>
    %8 = arith.addf %5, %7 : vector<16x128xf32>
    %c0_8 = arith.constant 0 : index
    %c0_9 = arith.constant 0 : index
    %9 = vector.load %arg5[%c0_8, %c0_9] : memref<1x128xf32, #tpu.memory_space<vmem>>, vector<1x128xf32>
    %10 = vector.broadcast %9 : vector<1x128xf32> to vector<16x128xf32>
    %11 = arith.addf %8, %10 : vector<16x128xf32>
    %cst_10 = arith.constant 0.000000e+00 : f32
    %12 = vector.broadcast %cst_10 : f32 to vector<16x128xf32>
    %13 = arith.maximumf %11, %12 : vector<16x128xf32>
    %14 = arith.truncf %13 : vector<16x128xf32> to vector<16x128xbf16>
    %c0_11 = arith.constant 0 : index
    %c0_12 = arith.constant 0 : index
    %15 = vector.load %arg6[%c0_11, %c0_12] : memref<128x128xbf16, #tpu.memory_space<vmem>>, vector<128x128xbf16>
    %cst_13 = arith.constant dense<0.000000e+00> : vector<16x128xf32>
    %16 = tpu.matmul %14, %15, %cst_13 {dimension_numbers = #tpu.dot_dimension_numbers<[1], [0], [0], [1], [0, 0, 1, 1], [], []>} : vector<16x128xbf16>, vector<128x128xbf16>, vector<16x128xf32> -> vector<16x128xf32>
    %c0_14 = arith.constant 0 : index
    %c0_15 = arith.constant 0 : index
    %17 = vector.load %arg7[%c0_14, %c0_15] : memref<1x128xf32, #tpu.memory_space<vmem>>, vector<1x128xf32>
    %18 = vector.broadcast %17 : vector<1x128xf32> to vector<16x128xf32>
    %19 = arith.addf %16, %18 : vector<16x128xf32>
    %cst_16 = arith.constant 0.000000e+00 : f32
    %20 = vector.broadcast %cst_16 : f32 to vector<16x128xf32>
    %21 = arith.maximumf %19, %20 : vector<16x128xf32>
    %22 = arith.truncf %21 : vector<16x128xf32> to vector<16x128xbf16>
    %c0_17 = arith.constant 0 : index
    %c0_18 = arith.constant 0 : index
    %23 = vector.load %arg8[%c0_17, %c0_18] : memref<128x128xbf16, #tpu.memory_space<vmem>>, vector<128x128xbf16>
    %cst_19 = arith.constant dense<0.000000e+00> : vector<16x128xf32>
    %24 = tpu.matmul %22, %23, %cst_19 {dimension_numbers = #tpu.dot_dimension_numbers<[1], [0], [0], [1], [0, 0, 1, 1], [], []>} : vector<16x128xbf16>, vector<128x128xbf16>, vector<16x128xf32> -> vector<16x128xf32>
    %c0_20 = arith.constant 0 : index
    %c0_21 = arith.constant 0 : index
    %25 = vector.load %arg9[%c0_20, %c0_21] : memref<1x128xf32, #tpu.memory_space<vmem>>, vector<1x128xf32>
    %26 = vector.broadcast %25 : vector<1x128xf32> to vector<16x128xf32>
    %27 = arith.addf %24, %26 : vector<16x128xf32>
    %28 = arith.truncf %27 : vector<16x128xf32> to vector<16x128xbf16>
    %c0_22 = arith.constant 0 : index
    %c0_23 = arith.constant 0 : index
    %29 = vector.load %arg10[%c0_22, %c0_23] : memref<16x128xbf16, #tpu.memory_space<vmem>>, vector<16x128xbf16>
    tpu.vector_store %arg10[%c0_22, %c0_23], %28 {strides = array<i32>} : memref<16x128xbf16, #tpu.memory_space<vmem>>, vector<16x128xbf16>,
    return
  }
  func.func @transform_0(%arg0: i32) -> (i32, i32) {
    %c0_i32 = arith.constant 0 : i32
    %c0_i32_0 = arith.constant 0 : i32
    return %arg0, %c0_i32 : i32, i32
  }
  func.func @transform_1(%arg0: i32) -> (i32, i32) {
    %c0_i32 = arith.constant 0 : i32
    %c0_i32_0 = arith.constant 0 : i32
    return %arg0, %c0_i32 : i32, i32
  }
  func.func @transform_2(%arg0: i32) -> (i32, i32) {
    %c0_i32 = arith.constant 0 : i32
    %c0_i32_0 = arith.constant 0 : i32
    %c0_i32_1 = arith.constant 0 : i32
    return %c0_i32, %c0_i32_0 : i32, i32
  }
  func.func @transform_3(%arg0: i32) -> (i32, i32) {
    %c0_i32 = arith.constant 0 : i32
    %c0_i32_0 = arith.constant 0 : i32
    %c0_i32_1 = arith.constant 0 : i32
    return %c0_i32, %c0_i32_0 : i32, i32
  }
  func.func @transform_4(%arg0: i32) -> (i32, i32) {
    %c0_i32 = arith.constant 0 : i32
    %c0_i32_0 = arith.constant 0 : i32
    %c0_i32_1 = arith.constant 0 : i32
    return %c0_i32, %c0_i32_0 : i32, i32
  }
  func.func @transform_5(%arg0: i32) -> (i32, i32) {
    %c0_i32 = arith.constant 0 : i32
    %c0_i32_0 = arith.constant 0 : i32
    %c0_i32_1 = arith.constant 0 : i32
    return %c0_i32, %c0_i32_0 : i32, i32
  }
  func.func @transform_6(%arg0: i32) -> (i32, i32) {
    %c0_i32 = arith.constant 0 : i32
    %c0_i32_0 = arith.constant 0 : i32
    %c0_i32_1 = arith.constant 0 : i32
    return %c0_i32, %c0_i32_0 : i32, i32
  }
  func.func @transform_7(%arg0: i32) -> (i32, i32) {
    %c0_i32 = arith.constant 0 : i32
    %c0_i32_0 = arith.constant 0 : i32
    %c0_i32_1 = arith.constant 0 : i32
    return %c0_i32, %c0_i32_0 : i32, i32
  }
  func.func @transform_8(%arg0: i32) -> (i32, i32) {
    %c0_i32 = arith.constant 0 : i32
    %c0_i32_0 = arith.constant 0 : i32
    %c0_i32_1 = arith.constant 0 : i32
    return %c0_i32, %c0_i32_0 : i32, i32
  }
  func.func @transform_9(%arg0: i32) -> (i32, i32) {
    %c0_i32 = arith.constant 0 : i32
    %c0_i32_0 = arith.constant 0 : i32
    return %arg0, %c0_i32 : i32, i32
  }
}

module attributes {stable_mosaic.version = 11 : i64} {
  func.func @_mlp_policy_kernel(%arg0: i32, %arg1: memref<16x16xf32, #tpu.memory_space<vmem>>, %arg2: memref<16x16xf32, #tpu.memory_space<vmem>>, %arg3: memref<16x128xbf16, #tpu.memory_space<vmem>>, %arg4: memref<16x128xbf16, #tpu.memory_space<vmem>>, %arg5: memref<1x128xf32, #tpu.memory_space<vmem>>, %arg6: memref<128x128xbf16, #tpu.memory_space<vmem>>, %arg7: memref<1x128xf32, #tpu.memory_space<vmem>>, %arg8: memref<128x128xbf16, #tpu.memory_space<vmem>>, %arg9: memref<1x128xf32, #tpu.memory_space<vmem>>, %arg10: memref<16x128xbf16, #tpu.memory_space<vmem>>) attributes {dimension_semantics = [#tpu.dimension_semantics<parallel>], iteration_bounds = array<i64: 2>, scalar_prefetch = 0 : i64, scratch_operands = 0 : i64, tpu.core_type = #tpu.core_type<tc>, window_params = [{transform_indices = @transform_0, window_bounds = array<i64: 16, 16>}, {transform_indices = @transform_1, window_bounds = array<i64: 16, 16>}, {pipeline_mode = #tpu.pipeline_mode<synchronous>, transform_indices = @transform_2, window_bounds = array<i64: 16, 128>}, {pipeline_mode = #tpu.pipeline_mode<synchronous>, transform_indices = @transform_3, window_bounds = array<i64: 16, 128>}, {pipeline_mode = #tpu.pipeline_mode<synchronous>, transform_indices = @transform_4, window_bounds = array<i64: 1, 128>}, {pipeline_mode = #tpu.pipeline_mode<synchronous>, transform_indices = @transform_5, window_bounds = array<i64: 128, 128>}, {pipeline_mode = #tpu.pipeline_mode<synchronous>, transform_indices = @transform_6, window_bounds = array<i64: 1, 128>}, {pipeline_mode = #tpu.pipeline_mode<synchronous>, transform_indices = @transform_7, window_bounds = array<i64: 128, 128>}, {pipeline_mode = #tpu.pipeline_mode<synchronous>, transform_indices = @transform_8, window_bounds = array<i64: 1, 128>}, {transform_indices = @transform_9, window_bounds = array<i64: 16, 128>}]} {
    %c0 = arith.constant 0 : index
    %c0_0 = arith.constant 0 : index
    %0 = vector.load %arg1[%c0, %c0_0] : memref<16x16xf32, #tpu.memory_space<vmem>>, vector<16x16xf32>
    %1 = arith.truncf %0 : vector<16x16xf32> to vector<16x16xbf16>
    %c0_1 = arith.constant 0 : index
    %c0_2 = arith.constant 0 : index
    %2 = vector.load %arg2[%c0_1, %c0_2] : memref<16x16xf32, #tpu.memory_space<vmem>>, vector<16x16xf32>
    %3 = arith.truncf %2 : vector<16x16xf32> to vector<16x16xbf16>
    %c0_3 = arith.constant 0 : index
    %c0_4 = arith.constant 0 : index
    %4 = vector.load %arg3[%c0_3, %c0_4] : memref<16x128xbf16, #tpu.memory_space<vmem>>, vector<16x128xbf16>
    %cst = arith.constant dense<0.000000e+00> : vector<16x128xf32>
    %5 = tpu.matmul %1, %4, %cst {dimension_numbers = #tpu.dot_dimension_numbers<[1], [0], [0], [1], [0, 0, 1, 1], [], []>} : vector<16x16xbf16>, vector<16x128xbf16>, vector<16x128xf32> -> vector<16x128xf32>
    %c0_5 = arith.constant 0 : index
    %c0_6 = arith.constant 0 : index
    %6 = vector.load %arg4[%c0_5, %c0_6] : memref<16x128xbf16, #tpu.memory_space<vmem>>, vector<16x128xbf16>
    %cst_7 = arith.constant dense<0.000000e+00> : vector<16x128xf32>
    %7 = tpu.matmul %3, %6, %cst_7 {dimension_numbers = #tpu.dot_dimension_numbers<[1], [0], [0], [1], [0, 0, 1, 1], [], []>} : vector<16x16xbf16>, vector<16x128xbf16>, vector<16x128xf32> -> vector<16x128xf32>
    %8 = arith.addf %5, %7 : vector<16x128xf32>
    %c0_8 = arith.constant 0 : index
    %c0_9 = arith.constant 0 : index
    %9 = vector.load %arg5[%c0_8, %c0_9] : memref<1x128xf32, #tpu.memory_space<vmem>>, vector<1x128xf32>
    %10 = vector.broadcast %9 : vector<1x128xf32> to vector<16x128xf32>
    %11 = arith.addf %8, %10 : vector<16x128xf32>
    %cst_10 = arith.constant 0.000000e+00 : f32
    %12 = vector.broadcast %cst_10 : f32 to vector<16x128xf32>
    %13 = arith.maximumf %11, %12 : vector<16x128xf32>
    %14 = arith.truncf %13 : vector<16x128xf32> to vector<16x128xbf16>
    %c0_11 = arith.constant 0 : index
    %c0_12 = arith.constant 0 : index
    %15 = vector.load %arg6[%c0_11, %c0_12] : memref<128x128xbf16, #tpu.memory_space<vmem>>, vector<128x128xbf16>
    %cst_13 = arith.constant dense<0.000000e+00> : vector<16x128xf32>
    %16 = tpu.matmul %14, %15, %cst_13 {dimension_numbers = #tpu.dot_dimension_numbers<[1], [0], [0], [1], [0, 0, 1, 1], [], []>} : vector<16x128xbf16>, vector<128x128xbf16>, vector<16x128xf32> -> vector<16x128xf32>
    %c0_14 = arith.constant 0 : index
    %c0_15 = arith.constant 0 : index
    %17 = vector.load %arg7[%c0_14, %c0_15] : memref<1x128xf32, #tpu.memory_space<vmem>>, vector<1x128xf32>
    %18 = vector.broadcast %17 : vector<1x128xf32> to vector<16x128xf32>
    %19 = arith.addf %16, %18 : vector<16x128xf32>
    %cst_16 = arith.constant 0.000000e+00 : f32
    %20 = vector.broadcast %cst_16 : f32 to vector<16x128xf32>
    %21 = arith.maximumf %19, %20 : vector<16x128xf32>
    %22 = arith.truncf %21 : vector<16x128xf32> to vector<16x128xbf16>
    %c0_17 = arith.constant 0 : index
    %c0_18 = arith.constant 0 : index
    %23 = vector.load %arg8[%c0_17, %c0_18] : memref<128x128xbf16, #tpu.memory_space<vmem>>, vector<128x128xbf16>
    %cst_19 = arith.constant dense<0.000000e+00> : vector<16x128xf32>
    %24 = tpu.matmul %22, %23, %cst_19 {dimension_numbers = #tpu.dot_dimension_numbers<[1], [0], [0], [1], [0, 0, 1, 1], [], []>} : vector<16x128xbf16>, vector<128x128xbf16>, vector<16x128xf32> -> vector<16x128xf32>
    %c0_20 = arith.constant 0 : index
    %c0_21 = arith.constant 0 : index
    %25 = vector.load %arg9[%c0_20, %c0_21] : memref<1x128xf32, #tpu.memory_space<vmem>>, vector<1x128xf32>
    %26 = vector.broadcast %25 : vector<1x128xf32> to vector<16x128xf32>
    %27 = arith.addf %24, %26 : vector<16x128xf32>
    %28 = arith.truncf %27 : vector<16x128xf32> to vector<16x128xbf16>
    %c0_22 = arith.constant 0 : index
    %c0_23 = arith.constant 0 : index
    %29 = vector.load %arg10[%c0_22, %c0_23] : memref<16x128xbf16, #tpu.memory_space<vmem>>, vector<16x128xbf16>
    tpu.vector_store %arg10[%c0_22, %c0_23], %28 {strides = array<i32>} : memref<16x128xbf16, #tpu.memory_space<vmem>>, vector<16x128xbf16>,
    return
  }
  func.func @transform_0(%arg0: i32) -> (i32, i32) {
    %c0_i32 = arith.constant 0 : i32
    %c0_i32_0 = arith.constant 0 : i32
    return %arg0, %c0_i32 : i32, i32
  }
  func.func @transform_1(%arg0: i32) -> (i32, i32) {
    %c0_i32 = arith.constant 0 : i32
    %c0_i32_0 = arith.constant 0 : i32
    return %arg0, %c0_i32 : i32, i32
  }
  func.func @transform_2(%arg0: i32) -> (i32, i32) {
    %c0_i32 = arith.constant 0 : i32
    %c0_i32_0 = arith.constant 0 : i32
    %c0_i32_1 = arith.constant 0 : i32
    return %c0_i32, %c0_i32_0 : i32, i32
  }
  func.func @transform_3(%arg0: i32) -> (i32, i32) {
    %c0_i32 = arith.constant 0 : i32
    %c0_i32_0 = arith.constant 0 : i32
    %c0_i32_1 = arith.constant 0 : i32
    return %c0_i32, %c0_i32_0 : i32, i32
  }
  func.func @transform_4(%arg0: i32) -> (i32, i32) {
    %c0_i32 = arith.constant 0 : i32
    %c0_i32_0 = arith.constant 0 : i32
    %c0_i32_1 = arith.constant 0 : i32
    return %c0_i32, %c0_i32_0 : i32, i32
  }
  func.func @transform_5(%arg0: i32) -> (i32, i32) {
    %c0_i32 = arith.constant 0 : i32
    %c0_i32_0 = arith.constant 0 : i32
    %c0_i32_1 = arith.constant 0 : i32
    return %c0_i32, %c0_i32_0 : i32, i32
  }
  func.func @transform_6(%arg0: i32) -> (i32, i32) {
    %c0_i32 = arith.constant 0 : i32
    %c0_i32_0 = arith.constant 0 : i32
    %c0_i32_1 = arith.constant 0 : i32
    return %c0_i32, %c0_i32_0 : i32, i32
  }
  func.func @transform_7(%arg0: i32) -> (i32, i32) {
    %c0_i32 = arith.constant 0 : i32
    %c0_i32_0 = arith.constant 0 : i32
    %c0_i32_1 = arith.constant 0 : i32
    return %c0_i32, %c0_i32_0 : i32, i32
  }
  func.func @transform_8(%arg0: i32) -> (i32, i32) {
    %c0_i32 = arith.constant 0 : i32
    %c0_i32_0 = arith.constant 0 : i32
    %c0_i32_1 = arith.constant 0 : i32
    return %c0_i32, %c0_i32_0 : i32, i32
  }
  func.func @transform_9(%arg0: i32) -> (i32, i32) {
    %c0_i32 = arith.constant 0 : i32
    %c0_i32_0 = arith.constant 0 : i32
    return %arg0, %c0_i32 : i32, i32
  }
}

</mosaic_0001>

<bundles_post_ra>
// kernel: tpu_custom_call.1
= control target key start
LH: loop header
LB: loop body
LE: loop exit
PB: predicated region body
PF: predicated region fallthrough
CT: control target
= control target key end

     0   :  { %14 = vsyncpa [#allocation3], 0  ;;  %s1388_s0 = inlined_call_operand.vmem [shape: f32[32,16], index: 0, kind: input, shape index: {}]   ;;  %s1389_s1 = inlined_call_operand.vmem [shape: f32[32,16], index: 1, kind: input, shape index: {}]   ;;  %s1390_s2 = inlined_call_operand.vmem [shape: bf16[16,128], index: 2, kind: input, shape index: {}]   ;;  %s1391_s3 = inlined_call_operand.vmem [shape: bf16[16,128], index: 3, kind: input, shape index: {}]   ;;  %s1392_s4 = inlined_call_operand.vmem [shape: f32[1,128], index: 4, kind: input, shape index: {}]   ;;  %s1393_s5 = inlined_call_operand.vmem [shape: bf16[128,128], index: 5, kind: input, shape index: {}]   ;;  %s1394_s6 = inlined_call_operand.vmem [shape: f32[1,128], index: 6, kind: input, shape index: {}]   ;;  %s1395_s7 = inlined_call_operand.hbm [shape: bf16[128,128], index: 7, kind: input, shape index: {}]   ;;  %s1396_s8 = inlined_call_operand.vmem [shape: f32[1,128], index: 8, kind: input, shape index: {}]   ;;  %s1397_s9 = inlined_call_operand.hbm [shape: bf16[32,128], index: 9, kind: output, shape index: {}]  }
   0x1   :  { %15 = vsyncpa [#allocation4], 0 }
   0x2   :  { %17 = vsyncpa [#allocation4 + $0x1], 0  ;;  %s1183_s30 = smov 0   ;;  %s1185_s10 = smov 0  }
   0x3   :  { %s1187_s11 = smov 0   ;;  %s1189_s12 = smov 0  }
   0x4 LB: > { %s1204_s13 = sadd.s32 4294967295, %s1123_s12   ;;  %s832_s14 = sadd.s32 4294967294, %s1123_s12   ;;  %s1123_s12 = sphi %s1189_s12, %s1413_s12   ;;  %s1119_s11 = sphi %s1187_s11, %s1412_s11   ;;  %s1115_s10 = sphi %s1185_s10, %s1411_s10   ;;  %s1111_s30 = sphi %s1183_s30, %s1410_s30  }
   0x5   : > { %s1208_s15 = sadd.s32 1, %s1123_s12   ;;  %s229_s16 = sadd.s32 1, %s1119_s11 }
   0x6   : > { %s226_s17 = ssub.s32 %s1123_s12, %s1208_s15  ;;  %p239_p0 = scmp.ne.s32.totalorder %s1119_s11, %s1115_s10 }
   0x7   : > { %p227_p1 = scmp.eq.s32.totalorder %s226_s17, 0  ;;  %p240_p2 = scmp.eq.s32.totalorder %s1204_s13, 1 }
   0x8   : > { %p245_p3 = scmp.ne.s32.totalorder %s1115_s10, %s1111_s30  ;;  %p246_p4 = scmp.eq.s32.totalorder %s832_s14, 1 }
   0x9   : > { %s1219_s18 = scalar_select %p227_p1, %s1119_s11, %s229_s16  }
   0xa   : > { %p1221_p5 = por %p240_p2, %p239_p0  ;;  %p1225_p6 = por %p246_p4, %p245_p3 }
   0xb   : > { %p833_p7 = scmp.ge.s32.totalorder %s1123_s12, 1  ;;  %p253_p8 = scmp.lt.s32.totalorder %s1123_s12, 3 }
   0xc   : > { %s1401_s19 = scalar_select %p1221_p5, 1, 0 }
   0xd   : > { %s1402_s20 = scalar_select %p1225_p6, 1, 0 }
   0xe   : > { %p1398_p9 = scmp.eq.s32.totalorder %s1204_s13, 0  ;;  %p1232_p10 = pnand %p833_p7, %p253_p8 }
   0xf   : > { %s1125_s22 = smov [#allocation2]   ;;  %s1029_s27 = scalar_lea.hbm %s1395_s7, 1024 }
  0x10   : > { %s1403_s21 = scalar_select %p1232_p10, 1, 0 }
  0x11   : > { %s280_s23 = sshll.u32 %s1125_s22, 4  ;;  %p961_p11 = pneg %p1232_p10  ;;  %s281_s23 = int_to_ptr.vmem [resolvable:$true] %s280_s23 }
  0x12   : > { %p1030_p13 = scmp.ne.s32.totalorder %s1395_s7, %s1029_s27  ;;  %p1036_p3 = scmp.lt.u32.totalorder %s1029_s27, %s1395_s7 }
  0x13   : > { %p1240_p12 = pnand %p1398_p9, %p961_p11 }
  0x15   : > { %p1031_p0 = pneg %p1240_p12 }
  0x17   : > { %p1032_p1 = pnand %p1031_p0, %p1030_p13 }
  0x19   : > { %p1033_p2 = pneg %p1032_p1 }
  0x1b   : > { %p1038_p4 = pnand %p1036_p3, %p1033_p2 }
  0x1d   : > { %1041 = shalt.err (!%p1038_p4)
}
  0x1e   : > { %s1042_s17 = scalar_lea.vmem %s281_s23, 1024  ;;  %p1050_p9 = scmp.lt.s32.totalorder %s281_s23, %s281_s23 }
  0x1f   : > { %p1043_p7 = scmp.ne.s32.totalorder %s281_s23, %s1042_s17  ;;  %p1051_p6 = scmp.lt.s32.totalorder %s1042_s17, %s1042_s17 }
  0x21   : > { %p1045_p8 = pnand %p1043_p7, %p1031_p0  ;;  %p1052_p5 = por %p1051_p6, %p1050_p9 }
  0x23   : > { %p1046_p11 = pneg %p1045_p8 }
  0x25   : > { %p1053_p10 = pnand %p1052_p5, %p1046_p11 }
  0x27   : > { %1056 = shalt.err (!%p1053_p10)
}
  0x28   : > { %s1126_s22 = smov 64   ;;  %s1127_s25 = smov 4  }
  0x29   : > { %964 = dma.hbm_to_vmem [thread:$0]  (!%p1240_p12), %s1395_s7, 1024, %s281_s23, [#allocation3], %s1126_s22, %s1126_s22, %s1127_s25  }
  0x2a   : > { %p1405_p13 = scmp.ne.s32.totalorder %s1403_s21, 0 }
  0x2b   : > { %p1406_p1 = scmp.eq.s32.totalorder (!%p1405_p13), %s1204_s13, 0 }
  0x2c   : > { %317 = sbr.rel (%p1405_p13) target bundleno = 737 (0x2e1), region = 56 }
  0x33   : > { %1102 = dma.done.wait (%p1406_p1), [#allocation3], 1024   ;;  %p1407_p0 = pmov %p1406_p1 }
  0x34   : > { %s839_s27 = sshll.u32 %s1204_s13, 1  ;;  %v1128_v0 = vmov 0.0   ;;  %vm1129_vm0 = vmmov 0   ;;  %v1011_v1 = vld [vmem:[%s1391_s3] sm:$0xff]   ;;  %vm388_vm1 = vcmask 130048   ;;  %v1014_v10 = vld [vmem:[%s1393_s5 + $0x8] sm:$0xff]  }
  0x35   : > { %1104 = vsyncadd (%p1407_p0), [#allocation3], 4294966272  ;;  %903 = vmatprep.subr.bf16.mxu0 %v1128_v0  ;;  %909 = vmatprep.subr.bf16.mxu1 %v1128_v0  ;;  %p359_p5 = scmp.lt.s32.totalorder %s839_s27, 3  ;;  %v1012_v2 = vld [vmem:[%s1390_s2] sm:$0xff]   ;;  %v1015_v11 = vld [vmem:[%s1393_s5 + $0x10] sm:$0xff]   ;;  %s355_s22 = sand.u32 1, %s1115_s10  }
  0x36   : > { %905 = vmatprep.mubr.msk.bf16.mxu0 %vm1129_vm0, %v1128_v0  ;;  %911 = vmatprep.mubr.msk.bf16.mxu1 %vm1129_vm0, %v1128_v0  ;;  %v1013_v9 = vld [vmem:[%s1393_s5] sm:$0xff]   ;;  %v1016_v12 = vld [vmem:[%s1393_s5 + $0x18] sm:$0xff]   ;;  %v1018_v14 = vld [vmem:[%s1393_s5 + $0x28] sm:$0xff]   ;;  %s838_s25 = sshll.u32 %s355_s22, 3  ;;  %s875_s23 = sshll.u32 %s1204_s13, 7 }
  0x37   : > { %s1415_s27 = smov (!%p359_p5, %s839_s27), 3  ;;  %904 = vmatpush3.bf16.msra.mxu0 %v1011_v1  ;;  %910 = vmatpush3.bf16.msra.mxu1 %v1012_v2  ;;  %v1017_v13 = vld [vmem:[%s1393_s5 + $0x20] sm:$0xff]   ;;  %v1019_v15 = vld [vmem:[%s1393_s5 + $0x30] sm:$0xff]   ;;  %v1020_v16 = vld [vmem:[%s1393_s5 + $0x38] sm:$0xff]   ;;  %s1345_s14 = scalar_lea.hbm %s1397_s9, %s875_s23 }
  0x38   : > { %s840_s21 = sshll.u32 %s1415_s27, 3  ;;  %915 = vmatprep.subr.bf16.mxu0 %v1128_v0  ;;  %935 = vmatprep.subr.bf16.mxu1 %v1128_v0  ;;  %v1021_v17 = vld [vmem:[#allocation2] sm:$0xff]   ;;  %v1022_v18 = vld [vmem:[#allocation2 + $0x8] sm:$0xff]   ;;  %v1023_v19 = vld [vmem:[#allocation2 + $0x10] sm:$0xff]   ;;  %s357_s27 = scalar_lea.vmem [#allocation5], %s838_s25 }
  0x39   : > { %s368_s29 = scalar_lea.vmem %s1389_s1, %s840_s21  ;;  %s362_s17 = scalar_lea.vmem %s1388_s0, %s840_s21  ;;  %v1024_v20 = vld [vmem:[#allocation2 + $0x18] sm:$0xff]   ;;  %v1025_v21 = vld [vmem:[#allocation2 + $0x20] sm:$0xff]   ;;  %v1026_v22 = vld [vmem:[#allocation2 + $0x28] sm:$0xff]  }
  0x3a   : > { %v375_v3 = vld [vmem:[%s368_s29] sm:$0xff]  ;;  %v376_v4 = vld [vmem:[%s368_s29 + $0x8] sm:$0xff]  ;;  %v1027_v39 = vld [vmem:[#allocation2 + $0x30] sm:$0xff]   ;;  %s746_s21 = sshll.u32 %s357_s27, 4  ;;  %s1347_s16 = scalar_lea.sflag [#allocation4], %s355_s22  ;;  %s1340_s21 = int_to_ptr.vmem [resolvable:$true] %s746_s21 }
  0x3b   : > { %v372_v5 = vld [vmem:[%s362_s17] sm:$0xff]  ;;  %v377_v6 = vpack.c.bf16 %v376_v4, %v375_v3  ;;  %v373_v7 = vld [vmem:[%s362_s17 + $0x8] sm:$0xff]  ;;  %v1028_v40 = vld [vmem:[#allocation2 + $0x38] sm:$0xff]   ;;  %s1057_s17 = scalar_lea.vmem %s1340_s21, 128  ;;  %p1408_p9 = scmp.ne.s32.totalorder %s1401_s19, 0 }
  0x3c   : > { %v374_v8 = vpack.c.bf16 %v373_v7, %v372_v5  ;;  %v847_v25 = vld [vmem:[%s1392_s4] ss:$0 sm:$0xff]  ;;  %p1058_p6 = scmp.ne.s32.totalorder %s1340_s21, %s1057_s17  ;;  %s1130_s13 = smov [#allocation5]  }
  0x3d   : > { %906 = vmatmul.mubr.msk.bf16.vlgmr.msra.gmra.mrb[0].mxu0 %vm388_vm1, %v377_v6  ;;  %v848_v41 = vld [vmem:[%s1394_s6] ss:$0 sm:$0xff]  ;;  %s1061_s25 = sshll.u32 %s1130_s13, 4  ;;  %s1062_s25 = int_to_ptr.vmem [resolvable:$false] %s1061_s25 }
  0x3e   : > { %912 = vmatmul.mubr.msk.bf16.vlgmr.msra.gmra.mrb[0].mxu1 %vm388_vm1, %v374_v8  ;;  %916 = vmatpush3.bf16.msra.mxu0 %v1013_v9  ;;  %v857_v51 = vld [vmem:[%s1396_s8] ss:$0 sm:$0xff]  ;;  %p1059_p10 = pnand %p1058_p6, %p1408_p9  ;;  %s1063_s26 = scalar_lea.vmem %s1062_s25, 256 }
  0x3f   : > { %917 = vmatprep.subr.bf16.mxu0 %v1128_v0  ;;  %931 = vmatprep.mubr.msk.bf16.mxu0 %vm1129_vm0, %v1128_v0  ;;  %p1064_p2 = scmp.lt.s32.totalorder %s1340_s21, %s1062_s25  ;;  %p1065_p3 = scmp.lt.s32.totalorder %s1063_s26, %s1057_s17 }
  0x40   : > { %951 = vmatprep.mubr.msk.bf16.mxu1 %vm1129_vm0, %v1128_v0  ;;  %936 = vmatpush3.bf16.msra.mxu1 %v1021_v17  ;;  %p1060_p12 = pneg %p1059_p10 }
  0x41   : > { %937 = vmatprep.subr.bf16.mxu1 %v1128_v0  ;;  %p1066_p4 = por %p1065_p3, %p1064_p2 }
  0x42   : > { %918 = vmatpush3.bf16.msra.mxu0 %v1014_v10 }
  0x43   : > { %919 = vmatprep.subr.bf16.mxu0 %v1128_v0  ;;  %p1067_p7 = pnand %p1066_p4, %p1060_p12 }
  0x44   : > { %938 = vmatpush3.bf16.msra.mxu1 %v1022_v18 }
  0x45   : > { %939 = vmatprep.subr.bf16.mxu1 %v1128_v0 }
  0x46   : > { %920 = vmatpush3.bf16.msra.mxu0 %v1015_v11 }
  0x47   : > { %921 = vmatprep.subr.bf16.mxu0 %v1128_v0 }
  0x48   : > { %940 = vmatpush3.bf16.msra.mxu1 %v1023_v19 }
  0x49   : > { %941 = vmatprep.subr.bf16.mxu1 %v1128_v0 }
  0x4a   : > { %922 = vmatpush3.bf16.msra.mxu0 %v1016_v12 }
  0x4b   : > { %923 = vmatprep.subr.bf16.mxu0 %v1128_v0 }
  0x4c   : > { %942 = vmatpush3.bf16.msra.mxu1 %v1024_v20 }
  0x4d   : > { %943 = vmatprep.subr.bf16.mxu1 %v1128_v0 }
  0x4e   : > { %924 = vmatpush3.bf16.msra.mxu0 %v1017_v13 }
  0x4f   : > { %925 = vmatprep.subr.bf16.mxu0 %v1128_v0 }
  0x50   : > { %944 = vmatpush3.bf16.msra.mxu1 %v1025_v21 }
  0x51   : > { %945 = vmatprep.subr.bf16.mxu1 %v1128_v0 }
  0x52   : > { %926 = vmatpush3.bf16.msra.mxu0 %v1018_v14 }
  0x53   : > { %927 = vmatprep.subr.bf16.mxu0 %v1128_v0 }
  0x54   : > { %946 = vmatpush3.bf16.msra.mxu1 %v1026_v22 }
  0x55   : > { %947 = vmatprep.subr.bf16.mxu1 %v1128_v0 }
  0x56   : > { %928 = vmatpush3.bf16.msra.mxu0 %v1019_v15 }
  0x57   : > { %929 = vmatprep.subr.bf16.mxu0 %v1128_v0 }
  0x58   : > { %948 = vmatpush3.bf16.msra.mxu1 %v1027_v39 }
  0x59   : > { %949 = vmatprep.subr.bf16.mxu1 %v1128_v0 }
  0x5a   : > { %930 = vmatpush3.bf16.msra.mxu0 %v1020_v16 }
  0x5c   : > { %950 = vmatpush3.bf16.msra.mxu1 %v1028_v40 }
 0x110   : > { %v426_v23 = vpop.f32.mrb[0].mxu0 }
 0x111   : > { %v476_v24 = vpop.f32.mrb[0].mxu1  ;;  %v907_v26 = vpop.f32.mrb[1].mxu0 }
 0x112   : > { %v477_v27 = vadd.f32 %v476_v24, %v426_v23  ;;  %v913_v28 = vpop.f32.mrb[1].mxu1  ;;  %v429_v29 = vpop.f32.mrb[2].mxu0 }
 0x113   : > { %v479_v30 = vpop.f32.mrb[2].mxu1  ;;  %v908_v31 = vpop.f32.mrb[3].mxu0 }
 0x114   : > { %v490_v32 = vadd.f32 %v847_v25, %v477_v27  ;;  %v480_v33 = vadd.f32 %v479_v30, %v429_v29  ;;  %v914_v34 = vpop.f32.mrb[3].mxu1 }
 0x116   : > { %v491_v35 = vadd.f32 %v847_v25, %v480_v33  ;;  %v492_v36 = vmax.f32 %v490_v32, 0.0 }
 0x118   : > { %v493_v37 = vmax.f32 %v491_v35, 0.0 }
 0x11a   : > { %v494_v38 = vpack.c.bf16 %v493_v37, %v492_v36 }
 0x11c   : > { %932 = vmatmul.mubr.bf16.vlgmr.msra.gmra.mrb[4].mxu0 %v494_v38 }
 0x1ef   : > { %v600_v42 = vpop.f32.mrb[4].mxu0 }
 0x1f0   : > { %v601_v43 = vadd.f32 %v848_v41, %v600_v42  ;;  %v933_v44 = vpop.f32.mrb[5].mxu0 }
 0x1f1   : > { %v603_v45 = vpop.f32.mrb[6].mxu0 }
 0x1f2   : > { %v604_v46 = vadd.f32 %v848_v41, %v603_v45  ;;  %v934_v47 = vpop.f32.mrb[7].mxu0  ;;  %v607_v48 = vmax.f32 %v601_v43, 0.0 }
 0x1f4   : > { %v608_v49 = vmax.f32 %v604_v46, 0.0 }
 0x1f6   : > { %v609_v50 = vpack.c.bf16 %v608_v49, %v607_v48 }
 0x1f8   : > { %952 = vmatmul.mubr.bf16.vlgmr.msra.gmra.mrb[4].mxu1 %v609_v50 }
 0x2cb   : > { %v715_v52 = vpop.f32.mrb[4].mxu1 }
 0x2cc   : > { %v953_v53 = vpop.f32.mrb[5].mxu1  ;;  %v716_v55 = vadd.f32 %v857_v51, %v715_v52 }
 0x2cd   : > { %v718_v54 = vpop.f32.mrb[6].mxu1 }
 0x2ce   : > { %v719_v56 = vadd.f32 %v857_v51, %v718_v54  ;;  %v954_v57 = vpop.f32.mrb[7].mxu1 }
 0x2d0   : > { %v879_v58 = vpack.c.bf16 %v719_v56, %v716_v55 }
 0x2d2   : > { %880 = vst [vmem:[%s357_s27] sm:$0xff] %v879_v58  }
 0x2d3   : > { %1070 = shalt.err (!%p1067_p7)
}
 0x2d4   : > { %s1071_s22 = scalar_lea.hbm %s1345_s14, 128  ;;  %s1075_s23 = scalar_lea.hbm %s1397_s9, 256 }
 0x2d5   : > { %p1072_p8 = scmp.ne.s32.totalorder %s1345_s14, %s1071_s22  ;;  %p1076_p1 = scmp.lt.u32.totalorder %s1345_s14, %s1397_s9 }
 0x2d6   : > { %p1077_p0 = scmp.lt.u32.totalorder %s1075_s23, %s1071_s22  ;;  %p1079_p6 = scmp.lt.u32.totalorder %s1071_s22, %s1345_s14 }
 0x2d7   : > { %p1073_p11 = pnand %p1072_p8, %p1408_p9 }
 0x2d8   : > { %p1078_p5 = por %p1077_p0, %p1076_p1 }
 0x2d9   : > { %p1074_p13 = pneg %p1073_p11 }
 0x2da   : > { %p1080_p10 = por %p1079_p6, %p1078_p5 }
 0x2dc   : > { %p1081_p12 = pnand %p1080_p10, %p1074_p13 }
 0x2de   : > { %1084 = shalt.err (!%p1081_p12)
}
 0x2df   : > { %s1131_s17 = smov 64   ;;  %s1132_s13 = smov 4  }
 0x2e0   : > { %959 = dma.vmem_to_hbm [thread:$0]  (%p1408_p9), %s1340_s21, 128, %s1345_s14, %s1347_s16, %s1131_s17, %s1131_s17, %s1132_s13  }
 0x2e1 PF: > { %p971_p2 = scmp.ge.s32.totalorder %s1123_s12, 2  ;;  %s761_s25 = sand.u32 1, %s1111_s30  }
 0x2e2   : > { %p1409_p3 = scmp.ne.s32.totalorder %s1402_s20, 0  ;;  %s762_s26 = scalar_lea.sflag [#allocation4], %s761_s25 }
 0x2e4   : > { %p966_p4 = pnand %p971_p2, %p1409_p3 }
 0x2e6   : > { %1106 = dma.done.wait (!%p966_p4), %s762_s26, 128  }
 0x2e7   : > { %1108 = vsyncadd (!%p966_p4), %s762_s26, 4294967168  ;;  %p20_p7 = scmp.ge.s32.totalorder %s1208_s15, 4   ;;  %s1410_s30 = smov %s1115_s10 }
 0x2e8   : > { %s1411_s10 = smov %s1119_s11  ;;  %s1412_s11 = smov %s1219_s18 }
 0x2e9   : > { %s1413_s12 = smov %s1208_s15  ;;  %22 = sbr.rel (!%p20_p7) target bundleno = 4 (0x4), region = 99 }
 0x2f0   :  { %767 = vsyncpa [#allocation3], 1 }
 0x2f1   :  { %769 = vsyncpa [#allocation3 + $0x1], 1 }
 0x2f2   :  { %770 = vsyncpa [#allocation4], 1 }
 0x2f3   :  { %772 = vsyncpa [#allocation4 + $0x1], 1 }

// kernel: tpu_custom_call.1
= control target key start
LH: loop header
LB: loop body
LE: loop exit
PB: predicated region body
PF: predicated region fallthrough
CT: control target
= control target key end

     0   :  { %14 = vsyncpa [#allocation3], 0  ;;  %s1388_s0 = inlined_call_operand.vmem [shape: f32[32,16], index: 0, kind: input, shape index: {}]   ;;  %s1389_s1 = inlined_call_operand.vmem [shape: f32[32,16], index: 1, kind: input, shape index: {}]   ;;  %s1390_s2 = inlined_call_operand.vmem [shape: bf16[16,128], index: 2, kind: input, shape index: {}]   ;;  %s1391_s3 = inlined_call_operand.vmem [shape: bf16[16,128], index: 3, kind: input, shape index: {}]   ;;  %s1392_s4 = inlined_call_operand.vmem [shape: f32[1,128], index: 4, kind: input, shape index: {}]   ;;  %s1393_s5 = inlined_call_operand.vmem [shape: bf16[128,128], index: 5, kind: input, shape index: {}]   ;;  %s1394_s6 = inlined_call_operand.vmem [shape: f32[1,128], index: 6, kind: input, shape index: {}]   ;;  %s1395_s7 = inlined_call_operand.hbm [shape: bf16[128,128], index: 7, kind: input, shape index: {}]   ;;  %s1396_s8 = inlined_call_operand.vmem [shape: f32[1,128], index: 8, kind: input, shape index: {}]   ;;  %s1397_s9 = inlined_call_operand.hbm [shape: bf16[32,128], index: 9, kind: output, shape index: {}]  }
   0x1   :  { %15 = vsyncpa [#allocation4], 0 }
   0x2   :  { %17 = vsyncpa [#allocation4 + $0x1], 0  ;;  %s1183_s30 = smov 0   ;;  %s1185_s10 = smov 0  }
   0x3   :  { %s1187_s11 = smov 0   ;;  %s1189_s12 = smov 0  }
   0x4 LB: > { %s1204_s13 = sadd.s32 4294967295, %s1123_s12   ;;  %s832_s14 = sadd.s32 4294967294, %s1123_s12   ;;  %s1123_s12 = sphi %s1189_s12, %s1413_s12   ;;  %s1119_s11 = sphi %s1187_s11, %s1412_s11   ;;  %s1115_s10 = sphi %s1185_s10, %s1411_s10   ;;  %s1111_s30 = sphi %s1183_s30, %s1410_s30  }
   0x5   : > { %s1208_s15 = sadd.s32 1, %s1123_s12   ;;  %s229_s16 = sadd.s32 1, %s1119_s11 }
   0x6   : > { %s226_s17 = ssub.s32 %s1123_s12, %s1208_s15  ;;  %p239_p0 = scmp.ne.s32.totalorder %s1119_s11, %s1115_s10 }
   0x7   : > { %p227_p1 = scmp.eq.s32.totalorder %s226_s17, 0  ;;  %p240_p2 = scmp.eq.s32.totalorder %s1204_s13, 1 }
   0x8   : > { %p245_p3 = scmp.ne.s32.totalorder %s1115_s10, %s1111_s30  ;;  %p246_p4 = scmp.eq.s32.totalorder %s832_s14, 1 }
   0x9   : > { %s1219_s18 = scalar_select %p227_p1, %s1119_s11, %s229_s16  }
   0xa   : > { %p1221_p5 = por %p240_p2, %p239_p0  ;;  %p1225_p6 = por %p246_p4, %p245_p3 }
   0xb   : > { %p833_p7 = scmp.ge.s32.totalorder %s1123_s12, 1  ;;  %p253_p8 = scmp.lt.s32.totalorder %s1123_s12, 3 }
   0xc   : > { %s1401_s19 = scalar_select %p1221_p5, 1, 0 }
   0xd   : > { %s1402_s20 = scalar_select %p1225_p6, 1, 0 }
   0xe   : > { %p1398_p9 = scmp.eq.s32.totalorder %s1204_s13, 0  ;;  %p1232_p10 = pnand %p833_p7, %p253_p8 }
   0xf   : > { %s1125_s22 = smov [#allocation2]   ;;  %s1029_s27 = scalar_lea.hbm %s1395_s7, 1024 }
  0x10   : > { %s1403_s21 = scalar_select %p1232_p10, 1, 0 }
  0x11   : > { %s280_s23 = sshll.u32 %s1125_s22, 4  ;;  %p961_p11 = pneg %p1232_p10  ;;  %s281_s23 = int_to_ptr.vmem [resolvable:$true] %s280_s23 }
  0x12   : > { %p1030_p13 = scmp.ne.s32.totalorder %s1395_s7, %s1029_s27  ;;  %p1036_p3 = scmp.lt.u32.totalorder %s1029_s27, %s1395_s7 }
  0x13   : > { %p1240_p12 = pnand %p1398_p9, %p961_p11 }
  0x15   : > { %p1031_p0 = pneg %p1240_p12 }
  0x17   : > { %p1032_p1 = pnand %p1031_p0, %p1030_p13 }
  0x19   : > { %p1033_p2 = pneg %p1032_p1 }
  0x1b   : > { %p1038_p4 = pnand %p1036_p3, %p1033_p2 }
  0x1d   : > { %1041 = shalt.err (!%p1038_p4)
}
  0x1e   : > { %s1042_s17 = scalar_lea.vmem %s281_s23, 1024  ;;  %p1050_p9 = scmp.lt.s32.totalorder %s281_s23, %s281_s23 }
  0x1f   : > { %p1043_p7 = scmp.ne.s32.totalorder %s281_s23, %s1042_s17  ;;  %p1051_p6 = scmp.lt.s32.totalorder %s1042_s17, %s1042_s17 }
  0x21   : > { %p1045_p8 = pnand %p1043_p7, %p1031_p0  ;;  %p1052_p5 = por %p1051_p6, %p1050_p9 }
  0x23   : > { %p1046_p11 = pneg %p1045_p8 }
  0x25   : > { %p1053_p10 = pnand %p1052_p5, %p1046_p11 }
  0x27   : > { %1056 = shalt.err (!%p1053_p10)
}
  0x28   : > { %s1126_s22 = smov 64   ;;  %s1127_s25 = smov 4  }
  0x29   : > { %964 = dma.hbm_to_vmem [thread:$0]  (!%p1240_p12), %s1395_s7, 1024, %s281_s23, [#allocation3], %s1126_s22, %s1126_s22, %s1127_s25  }
  0x2a   : > { %p1405_p13 = scmp.ne.s32.totalorder %s1403_s21, 0 }
  0x2b   : > { %p1406_p1 = scmp.eq.s32.totalorder (!%p1405_p13), %s1204_s13, 0 }
  0x2c   : > { %317 = sbr.rel (%p1405_p13) target bundleno = 737 (0x2e1), region = 56 }
  0x33   : > { %1102 = dma.done.wait (%p1406_p1), [#allocation3], 1024   ;;  %p1407_p0 = pmov %p1406_p1 }
  0x34   : > { %s839_s27 = sshll.u32 %s1204_s13, 1  ;;  %v1128_v0 = vmov 0.0   ;;  %vm1129_vm0 = vmmov 0   ;;  %v1011_v1 = vld [vmem:[%s1391_s3] sm:$0xff]   ;;  %vm388_vm1 = vcmask 130048   ;;  %v1014_v10 = vld [vmem:[%s1393_s5 + $0x8] sm:$0xff]  }
  0x35   : > { %1104 = vsyncadd (%p1407_p0), [#allocation3], 4294966272  ;;  %903 = vmatprep.subr.bf16.mxu0 %v1128_v0  ;;  %909 = vmatprep.subr.bf16.mxu1 %v1128_v0  ;;  %p359_p5 = scmp.lt.s32.totalorder %s839_s27, 3  ;;  %v1012_v2 = vld [vmem:[%s1390_s2] sm:$0xff]   ;;  %v1015_v11 = vld [vmem:[%s1393_s5 + $0x10] sm:$0xff]   ;;  %s355_s22 = sand.u32 1, %s1115_s10  }
  0x36   : > { %905 = vmatprep.mubr.msk.bf16.mxu0 %vm1129_vm0, %v1128_v0  ;;  %911 = vmatprep.mubr.msk.bf16.mxu1 %vm1129_vm0, %v1128_v0  ;;  %v1013_v9 = vld [vmem:[%s1393_s5] sm:$0xff]   ;;  %v1016_v12 = vld [vmem:[%s1393_s5 + $0x18] sm:$0xff]   ;;  %v1018_v14 = vld [vmem:[%s1393_s5 + $0x28] sm:$0xff]   ;;  %s838_s25 = sshll.u32 %s355_s22, 3  ;;  %s875_s23 = sshll.u32 %s1204_s13, 7 }
  0x37   : > { %s1415_s27 = smov (!%p359_p5, %s839_s27), 3  ;;  %904 = vmatpush3.bf16.msra.mxu0 %v1011_v1  ;;  %910 = vmatpush3.bf16.msra.mxu1 %v1012_v2  ;;  %v1017_v13 = vld [vmem:[%s1393_s5 + $0x20] sm:$0xff]   ;;  %v1019_v15 = vld [vmem:[%s1393_s5 + $0x30] sm:$0xff]   ;;  %v1020_v16 = vld [vmem:[%s1393_s5 + $0x38] sm:$0xff]   ;;  %s1345_s14 = scalar_lea.hbm %s1397_s9, %s875_s23 }
  0x38   : > { %s840_s21 = sshll.u32 %s1415_s27, 3  ;;  %915 = vmatprep.subr.bf16.mxu0 %v1128_v0  ;;  %935 = vmatprep.subr.bf16.mxu1 %v1128_v0  ;;  %v1021_v17 = vld [vmem:[#allocation2] sm:$0xff]   ;;  %v1022_v18 = vld [vmem:[#allocation2 + $0x8] sm:$0xff]   ;;  %v1023_v19 = vld [vmem:[#allocation2 + $0x10] sm:$0xff]   ;;  %s357_s27 = scalar_lea.vmem [#allocation5], %s838_s25 }
  0x39   : > { %s368_s29 = scalar_lea.vmem %s1389_s1, %s840_s21  ;;  %s362_s17 = scalar_lea.vmem %s1388_s0, %s840_s21  ;;  %v1024_v20 = vld [vmem:[#allocation2 + $0x18] sm:$0xff]   ;;  %v1025_v21 = vld [vmem:[#allocation2 + $0x20] sm:$0xff]   ;;  %v1026_v22 = vld [vmem:[#allocation2 + $0x28] sm:$0xff]  }
  0x3a   : > { %v375_v3 = vld [vmem:[%s368_s29] sm:$0xff]  ;;  %v376_v4 = vld [vmem:[%s368_s29 + $0x8] sm:$0xff]  ;;  %v1027_v39 = vld [vmem:[#allocation2 + $0x30] sm:$0xff]   ;;  %s746_s21 = sshll.u32 %s357_s27, 4  ;;  %s1347_s16 = scalar_lea.sflag [#allocation4], %s355_s22  ;;  %s1340_s21 = int_to_ptr.vmem [resolvable:$true] %s746_s21 }
  0x3b   : > { %v372_v5 = vld [vmem:[%s362_s17] sm:$0xff]  ;;  %v377_v6 = vpack.c.bf16 %v376_v4, %v375_v3  ;;  %v373_v7 = vld [vmem:[%s362_s17 + $0x8] sm:$0xff]  ;;  %v1028_v40 = vld [vmem:[#allocation2 + $0x38] sm:$0xff]   ;;  %s1057_s17 = scalar_lea.vmem %s1340_s21, 128  ;;  %p1408_p9 = scmp.ne.s32.totalorder %s1401_s19, 0 }
  0x3c   : > { %v374_v8 = vpack.c.bf16 %v373_v7, %v372_v5  ;;  %v847_v25 = vld [vmem:[%s1392_s4] ss:$0 sm:$0xff]  ;;  %p1058_p6 = scmp.ne.s32.totalorder %s1340_s21, %s1057_s17  ;;  %s1130_s13 = smov [#allocation5]  }
  0x3d   : > { %906 = vmatmul.mubr.msk.bf16.vlgmr.msra.gmra.mrb[0].mxu0 %vm388_vm1, %v377_v6  ;;  %v848_v41 = vld [vmem:[%s1394_s6] ss:$0 sm:$0xff]  ;;  %s1061_s25 = sshll.u32 %s1130_s13, 4  ;;  %s1062_s25 = int_to_ptr.vmem [resolvable:$false] %s1061_s25 }
  0x3e   : > { %912 = vmatmul.mubr.msk.bf16.vlgmr.msra.gmra.mrb[0].mxu1 %vm388_vm1, %v374_v8  ;;  %916 = vmatpush3.bf16.msra.mxu0 %v1013_v9  ;;  %v857_v51 = vld [vmem:[%s1396_s8] ss:$0 sm:$0xff]  ;;  %p1059_p10 = pnand %p1058_p6, %p1408_p9  ;;  %s1063_s26 = scalar_lea.vmem %s1062_s25, 256 }
  0x3f   : > { %917 = vmatprep.subr.bf16.mxu0 %v1128_v0  ;;  %931 = vmatprep.mubr.msk.bf16.mxu0 %vm1129_vm0, %v1128_v0  ;;  %p1064_p2 = scmp.lt.s32.totalorder %s1340_s21, %s1062_s25  ;;  %p1065_p3 = scmp.lt.s32.totalorder %s1063_s26, %s1057_s17 }
  0x40   : > { %951 = vmatprep.mubr.msk.bf16.mxu1 %vm1129_vm0, %v1128_v0  ;;  %936 = vmatpush3.bf16.msra.mxu1 %v1021_v17  ;;  %p1060_p12 = pneg %p1059_p10 }
  0x41   : > { %937 = vmatprep.subr.bf16.mxu1 %v1128_v0  ;;  %p1066_p4 = por %p1065_p3, %p1064_p2 }
  0x42   : > { %918 = vmatpush3.bf16.msra.mxu0 %v1014_v10 }
  0x43   : > { %919 = vmatprep.subr.bf16.mxu0 %v1128_v0  ;;  %p1067_p7 = pnand %p1066_p4, %p1060_p12 }
  0x44   : > { %938 = vmatpush3.bf16.msra.mxu1 %v1022_v18 }
  0x45   : > { %939 = vmatprep.subr.bf16.mxu1 %v1128_v0 }
  0x46   : > { %920 = vmatpush3.bf16.msra.mxu0 %v1015_v11 }
  0x47   : > { %921 = vmatprep.subr.bf16.mxu0 %v1128_v0 }
  0x48   : > { %940 = vmatpush3.bf16.msra.mxu1 %v1023_v19 }
  0x49   : > { %941 = vmatprep.subr.bf16.mxu1 %v1128_v0 }
  0x4a   : > { %922 = vmatpush3.bf16.msra.mxu0 %v1016_v12 }
  0x4b   : > { %923 = vmatprep.subr.bf16.mxu0 %v1128_v0 }
  0x4c   : > { %942 = vmatpush3.bf16.msra.mxu1 %v1024_v20 }
  0x4d   : > { %943 = vmatprep.subr.bf16.mxu1 %v1128_v0 }
  0x4e   : > { %924 = vmatpush3.bf16.msra.mxu0 %v1017_v13 }
  0x4f   : > { %925 = vmatprep.subr.bf16.mxu0 %v1128_v0 }
  0x50   : > { %944 = vmatpush3.bf16.msra.mxu1 %v1025_v21 }
  0x51   : > { %945 = vmatprep.subr.bf16.mxu1 %v1128_v0 }
  0x52   : > { %926 = vmatpush3.bf16.msra.mxu0 %v1018_v14 }
  0x53   : > { %927 = vmatprep.subr.bf16.mxu0 %v1128_v0 }
  0x54   : > { %946 = vmatpush3.bf16.msra.mxu1 %v1026_v22 }
  0x55   : > { %947 = vmatprep.subr.bf16.mxu1 %v1128_v0 }
  0x56   : > { %928 = vmatpush3.bf16.msra.mxu0 %v1019_v15 }
  0x57   : > { %929 = vmatprep.subr.bf16.mxu0 %v1128_v0 }
  0x58   : > { %948 = vmatpush3.bf16.msra.mxu1 %v1027_v39 }
  0x59   : > { %949 = vmatprep.subr.bf16.mxu1 %v1128_v0 }
  0x5a   : > { %930 = vmatpush3.bf16.msra.mxu0 %v1020_v16 }
  0x5c   : > { %950 = vmatpush3.bf16.msra.mxu1 %v1028_v40 }
 0x110   : > { %v426_v23 = vpop.f32.mrb[0].mxu0 }
 0x111   : > { %v476_v24 = vpop.f32.mrb[0].mxu1  ;;  %v907_v26 = vpop.f32.mrb[1].mxu0 }
 0x112   : > { %v477_v27 = vadd.f32 %v476_v24, %v426_v23  ;;  %v913_v28 = vpop.f32.mrb[1].mxu1  ;;  %v429_v29 = vpop.f32.mrb[2].mxu0 }
 0x113   : > { %v479_v30 = vpop.f32.mrb[2].mxu1  ;;  %v908_v31 = vpop.f32.mrb[3].mxu0 }
 0x114   : > { %v490_v32 = vadd.f32 %v847_v25, %v477_v27  ;;  %v480_v33 = vadd.f32 %v479_v30, %v429_v29  ;;  %v914_v34 = vpop.f32.mrb[3].mxu1 }
 0x116   : > { %v491_v35 = vadd.f32 %v847_v25, %v480_v33  ;;  %v492_v36 = vmax.f32 %v490_v32, 0.0 }
 0x118   : > { %v493_v37 = vmax.f32 %v491_v35, 0.0 }
 0x11a   : > { %v494_v38 = vpack.c.bf16 %v493_v37, %v492_v36 }
 0x11c   : > { %932 = vmatmul.mubr.bf16.vlgmr.msra.gmra.mrb[4].mxu0 %v494_v38 }
 0x1ef   : > { %v600_v42 = vpop.f32.mrb[4].mxu0 }
 0x1f0   : > { %v601_v43 = vadd.f32 %v848_v41, %v600_v42  ;;  %v933_v44 = vpop.f32.mrb[5].mxu0 }
 0x1f1   : > { %v603_v45 = vpop.f32.mrb[6].mxu0 }
 0x1f2   : > { %v604_v46 = vadd.f32 %v848_v41, %v603_v45  ;;  %v934_v47 = vpop.f32.mrb[7].mxu0  ;;  %v607_v48 = vmax.f32 %v601_v43, 0.0 }
 0x1f4   : > { %v608_v49 = vmax.f32 %v604_v46, 0.0 }
 0x1f6   : > { %v609_v50 = vpack.c.bf16 %v608_v49, %v607_v48 }
 0x1f8   : > { %952 = vmatmul.mubr.bf16.vlgmr.msra.gmra.mrb[4].mxu1 %v609_v50 }
 0x2cb   : > { %v715_v52 = vpop.f32.mrb[4].mxu1 }
 0x2cc   : > { %v953_v53 = vpop.f32.mrb[5].mxu1  ;;  %v716_v55 = vadd.f32 %v857_v51, %v715_v52 }
 0x2cd   : > { %v718_v54 = vpop.f32.mrb[6].mxu1 }
 0x2ce   : > { %v719_v56 = vadd.f32 %v857_v51, %v718_v54  ;;  %v954_v57 = vpop.f32.mrb[7].mxu1 }
 0x2d0   : > { %v879_v58 = vpack.c.bf16 %v719_v56, %v716_v55 }
 0x2d2   : > { %880 = vst [vmem:[%s357_s27] sm:$0xff] %v879_v58  }
 0x2d3   : > { %1070 = shalt.err (!%p1067_p7)
}
 0x2d4   : > { %s1071_s22 = scalar_lea.hbm %s1345_s14, 128  ;;  %s1075_s23 = scalar_lea.hbm %s1397_s9, 256 }
 0x2d5   : > { %p1072_p8 = scmp.ne.s32.totalorder %s1345_s14, %s1071_s22  ;;  %p1076_p1 = scmp.lt.u32.totalorder %s1345_s14, %s1397_s9 }
 0x2d6   : > { %p1077_p0 = scmp.lt.u32.totalorder %s1075_s23, %s1071_s22  ;;  %p1079_p6 = scmp.lt.u32.totalorder %s1071_s22, %s1345_s14 }
 0x2d7   : > { %p1073_p11 = pnand %p1072_p8, %p1408_p9 }
 0x2d8   : > { %p1078_p5 = por %p1077_p0, %p1076_p1 }
 0x2d9   : > { %p1074_p13 = pneg %p1073_p11 }
 0x2da   : > { %p1080_p10 = por %p1079_p6, %p1078_p5 }
 0x2dc   : > { %p1081_p12 = pnand %p1080_p10, %p1074_p13 }
 0x2de   : > { %1084 = shalt.err (!%p1081_p12)
}
 0x2df   : > { %s1131_s17 = smov 64   ;;  %s1132_s13 = smov 4  }
 0x2e0   : > { %959 = dma.vmem_to_hbm [thread:$0]  (%p1408_p9), %s1340_s21, 128, %s1345_s14, %s1347_s16, %s1131_s17, %s1131_s17, %s1132_s13  }
 0x2e1 PF: > { %p971_p2 = scmp.ge.s32.totalorder %s1123_s12, 2  ;;  %s761_s25 = sand.u32 1, %s1111_s30  }
 0x2e2   : > { %p1409_p3 = scmp.ne.s32.totalorder %s1402_s20, 0  ;;  %s762_s26 = scalar_lea.sflag [#allocation4], %s761_s25 }
 0x2e4   : > { %p966_p4 = pnand %p971_p2, %p1409_p3 }
 0x2e6   : > { %1106 = dma.done.wait (!%p966_p4), %s762_s26, 128  }
 0x2e7   : > { %1108 = vsyncadd (!%p966_p4), %s762_s26, 4294967168  ;;  %p20_p7 = scmp.ge.s32.totalorder %s1208_s15, 4   ;;  %s1410_s30 = smov %s1115_s10 }
 0x2e8   : > { %s1411_s10 = smov %s1119_s11  ;;  %s1412_s11 = smov %s1219_s18 }
 0x2e9   : > { %s1413_s12 = smov %s1208_s15  ;;  %22 = sbr.rel (!%p20_p7) target bundleno = 4 (0x4), region = 99 }
 0x2f0   :  { %767 = vsyncpa [#allocation3], 1 }
 0x2f1   :  { %769 = vsyncpa [#allocation3 + $0x1], 1 }
 0x2f2   :  { %770 = vsyncpa [#allocation4], 1 }
 0x2f3   :  { %772 = vsyncpa [#allocation4 + $0x1], 1 }

</bundles_post_ra>
